<compile_context>
chip_gen: v6e
topology: v6e:2x2x1
jax: 0.10.0
libtpu: 0.0.40
codegen_flags: <defaults>
</compile_context>

<pallas_src>
import jax
import jax.numpy as jnp
from jax.experimental import pallas as pl
from jax.experimental.pallas import tpu as pltpu

_COLS = 128  # lane width


def add_one_kernel(x_ref, o_ref):
    # Python int 1 is weakly typed -> preserves input dtype (no f32 promotion).
    o_ref[...] = x_ref[...] + 1


def _add_one_2d(x2d, *, tile_r, itemsize):
    """Run the tiled Pallas kernel on a lane-dense (rows, 128) array."""
    rows, cols = x2d.shape
    n = rows * cols
    grid = (pl.cdiv(rows, tile_r),)  # partial last block is masked by Pallas
    return pl.pallas_call(
        add_one_kernel,
        out_shape=jax.ShapeDtypeStruct((rows, cols), x2d.dtype),
        grid_spec=pltpu.PrefetchScalarGridSpec(
            num_scalar_prefetch=0,
            grid=grid,
            in_specs=[pl.BlockSpec((tile_r, cols), lambda i: (i, 0))],
            out_specs=pl.BlockSpec((tile_r, cols), lambda i: (i, 0)),
        ),
        # Memory-bound hint for XLA's scheduler: read + write of the slab.
        cost_estimate=pl.CostEstimate(
            flops=n, transcendentals=0, bytes_accessed=2 * n * itemsize
        ),
        compiler_params=pltpu.CompilerParams(
            # "parallel" lets the grid shard across v7x's two TensorCores;
            # harmless (no-op) on single-TC v5e/v6e.
            dimension_semantics=("parallel",),
            # 4 MiB block x (2 in + 2 out double buffers) = 16 MiB; 32 MiB is
            # safe on all of v5e/v6e (128 MiB VMEM) and v7x (64 MiB VMEM).
            vmem_limit_bytes=32 << 20,
        ),
    )(x2d)


def add_one(x, *, target_block_bytes=4 << 20, min_pallas_bytes=1 << 20):
    """Elementwise x + 1.

    Blocks are ~4 MiB (fewer grid steps -> per-step overhead amortized on
    v5e/v6e, still well inside v7x's 64 MiB VMEM with double buffering).
    Non-128-divisible sizes are split: an aligned main prefix goes through the
    kernel and the <128-element tail through plain XLA — no full-array pad or
    output-slice copies on this bandwidth-bound op.
    """
    orig_shape = x.shape
    dtype = x.dtype
    n = x.size
    if n == 0:
        return x

    itemsize = jnp.dtype(dtype).itemsize

    # Tiny tensors: grid bookkeeping + reshape plumbing dominate; let XLA fuse.
    if n * itemsize < min_pallas_bytes:
        return x + 1

    cols = _COLS
    tail = n % cols            # static (shape-derived) decision
    n_main = n - tail
    if n_main == 0:            # fewer than 128 elements total
        return x + 1

    # dtype-aware sublane multiple: 8 for f32, 16 for bf16/f16, 32 for int8.
    sublane = max(8, 32 // max(itemsize, 1))

    rows = n_main // cols
    ru_rows = -(-rows // sublane) * sublane
    # Rows per block targeting ~target_block_bytes, rounded to the sublane
    # multiple and capped at the (rounded-up) row count.
    tile_r = (target_block_bytes // (cols * itemsize)) // sublane * sublane
    tile_r = max(sublane, min(tile_r, ru_rows))

    flat = x.reshape(-1)
    if tail:
        main2d = flat[:n_main].reshape(rows, cols)
    else:
        main2d = flat.reshape(rows, cols)

    out_main = _add_one_2d(main2d, tile_r=tile_r, itemsize=itemsize)

    if tail:
        # <128-element tail handled by a tiny fused XLA op on the slice.
        out_flat = jnp.concatenate([out_main.reshape(-1), flat[n_main:] + 1])
    else:
        out_flat = out_main.reshape(-1)
    return out_flat.reshape(orig_shape)


if __name__ == "__main__":
    key = jax.random.PRNGKey(0)
    k1, k2 = jax.random.split(key)

    # Module-shaped input (batch=2, channels=4, 16x16). Forced through the
    # Pallas path (min_pallas_bytes=0) so the kernel compiles and runs here.
    x = jax.random.normal(key, (2, 4, 16, 16), dtype=jnp.float32)
    out = add_one(x, min_pallas_bytes=0)
    jax.block_until_ready(out)
    assert out.shape == x.shape and out.dtype == x.dtype
    assert jnp.allclose(out, x + 1, atol=1e-6), "mismatch vs reference (aligned)"

    # Ragged size (n % 128 != 0): kernel on the aligned prefix + XLA tail,
    # no full-array pad / output slice.
    y = jax.random.normal(k1, (7, 37), dtype=jnp.float32)  # 259 elements
    outy = add_one(y, min_pallas_bytes=0)
    jax.block_until_ready(outy)
    assert outy.shape == y.shape and outy.dtype == y.dtype
    assert jnp.allclose(outy, y + 1, atol=1e-6), "mismatch vs reference (ragged)"

    # bf16 with rows not a multiple of the row tile -> partial-block masking.
    z = jax.random.normal(k2, (375, 128), dtype=jnp.bfloat16)
    outz = add_one(z, min_pallas_bytes=0)
    jax.block_until_ready(outz)
    assert outz.dtype == z.dtype
    assert jnp.array_equal(outz, z + 1), "mismatch vs reference (bf16)"

    # Small-input fast path (pure XLA, no pallas_call launched).
    w = add_one(x)
    jax.block_until_ready(w)
    assert jnp.allclose(w, x + 1, atol=1e-6), "mismatch vs reference (fast path)"

    print("KERNEL_OK")
</pallas_src>

<mosaic_0001>
module attributes {stable_mosaic.version = 11 : i64} {
  func.func @add_one_kernel(%arg0: i32, %arg1: memref<16x128xf32, #tpu.memory_space<vmem>>, %arg2: memref<16x128xf32, #tpu.memory_space<vmem>>) attributes {dimension_semantics = [#tpu.dimension_semantics<parallel>], iteration_bounds = array<i64: 1>, scalar_prefetch = 0 : i64, scratch_operands = 0 : i64, tpu.core_type = #tpu.core_type<tc>, window_params = [{transform_indices = @transform_0, window_bounds = array<i64: 16, 128>}, {transform_indices = @transform_1, window_bounds = array<i64: 16, 128>}]} {
    %c0 = arith.constant 0 : index
    %c0_0 = arith.constant 0 : index
    %0 = vector.load %arg1[%c0, %c0_0] : memref<16x128xf32, #tpu.memory_space<vmem>>, vector<16x128xf32>
    %cst = arith.constant 1.000000e+00 : f32
    %1 = vector.broadcast %cst : f32 to vector<16x128xf32>
    %2 = arith.addf %0, %1 : vector<16x128xf32>
    %c0_1 = arith.constant 0 : index
    %c0_2 = arith.constant 0 : index
    %3 = vector.load %arg2[%c0_1, %c0_2] : memref<16x128xf32, #tpu.memory_space<vmem>>, vector<16x128xf32>
    tpu.vector_store %arg2[%c0_1, %c0_2], %2 {strides = array<i32>} : memref<16x128xf32, #tpu.memory_space<vmem>>, vector<16x128xf32>,
    return
  }
  func.func @transform_0(%arg0: i32) -> (i32, i32) {
    %c0_i32 = arith.constant 0 : i32
    %c0_i32_0 = arith.constant 0 : i32
    return %arg0, %c0_i32 : i32, i32
  }
  func.func @transform_1(%arg0: i32) -> (i32, i32) {
    %c0_i32 = arith.constant 0 : i32
    %c0_i32_0 = arith.constant 0 : i32
    return %arg0, %c0_i32 : i32, i32
  }
}

</mosaic_0001>

<bundles_post_ra>
// kernel: tpu_custom_call.1
= control target key start
LH: loop header
LB: loop body
LE: loop exit
PB: predicated region body
PF: predicated region fallthrough
CT: control target
= control target key end

     0   :  { %6 = vsyncpa [#allocation3], 0  ;;  %s114_s0 = inlined_call_operand.hbm [shape: f32[16,128], index: 0, kind: input, shape index: {}]   ;;  %s115_s1 = inlined_call_operand.hbm [shape: f32[16,128], index: 1, kind: output, shape index: {}]  }
   0x1   :  { %7 = vsyncpa [#allocation4], 0  ;;  %s94_s6 = smov [#allocation2]  }
   0x2   :  { %s13_s7 = sshll.u32 %s94_s6, 4  ;;  %s14_s7 = int_to_ptr.vmem [resolvable:$true] %s13_s7 }
   0x3   :  { %s58_s8 = scalar_lea.vmem %s14_s7, 256  ;;  %p63_p1 = scmp.lt.s32.totalorder %s14_s7, %s14_s7 }
   0x4   :  { %p59_p0 = scmp.ne.s32.totalorder %s14_s7, %s58_s8  ;;  %p64_p2 = scmp.lt.s32.totalorder %s58_s8, %s58_s8 }
   0x6   :  { %p65_p3 = por %p64_p2, %p63_p1 }
   0x8   :  { %p66_p4 = pnand %p65_p3, %p59_p0 }
   0xa   :  { %69 = shalt.err (!%p66_p4)
}
   0xb   :  { %s95_s9 = smov 128   ;;  %s96_s10 = smov 8  }
   0xc   :  { %19 = dma.hbm_to_vmem [thread:$0]  %s114_s0, 256, %s14_s7, [#allocation3], %s95_s9, %s95_s9, %s96_s10  }
   0xd   :  { %90 = dma.done.wait [#allocation3], 256  }
   0xe   :  { %91 = vsyncadd [#allocation3], 4294967040  ;;  %s97_s13 = smov [#allocation5]   ;;  %v23_v0 = vld [vmem:[#allocation2] sm:$0xff]  ;;  %v24_v1 = vld [vmem:[#allocation2 + $0x8] sm:$0xff] }
   0xf   :  { %s34_s14 = sshll.u32 %s97_s13, 4  ;;  %v25_v2 = vadd.f32 1.0, %v23_v0  ;;  %v26_v3 = vadd.f32 1.0, %v24_v1  ;;  %s35_s14 = int_to_ptr.vmem [resolvable:$true] %s34_s14 }
  0x10   :  { %s70_s15 = scalar_lea.vmem %s35_s14, 256  ;;  %p75_p6 = scmp.lt.s32.totalorder %s35_s14, %s35_s14 }
  0x11   :  { %27 = vst [vmem:[#allocation5] sm:$0xff] %v25_v2  ;;  %28 = vst [vmem:[#allocation5 + $0x8] sm:$0xff] %v26_v3  ;;  %p71_p5 = scmp.ne.s32.totalorder %s35_s14, %s70_s15  ;;  %p76_p7 = scmp.lt.s32.totalorder %s70_s15, %s70_s15 }
  0x13   :  { %p77_p8 = por %p76_p7, %p75_p6 }
  0x15   :  { %p78_p9 = pnand %p77_p8, %p71_p5 }
  0x17   :  { %81 = shalt.err (!%p78_p9)
}
  0x18   :  { %40 = dma.vmem_to_hbm [thread:$0]  %s35_s14, 256, %s115_s1, [#allocation4], %s95_s9, %s95_s9, %s96_s10  }
  0x19   :  { %92 = dma.done.wait [#allocation4], 256  }
  0x1a   :  { %93 = vsyncadd [#allocation4], 4294967040 }
  0x1b   :  { %44 = vsyncpa [#allocation3], 1 }
  0x1c   :  { %45 = vsyncpa [#allocation4], 1 }

</bundles_post_ra>
